<compile_context>
chip_gen: v7x
topology: tpu7x:2x2x1
jax: 0.10.0
libtpu: 0.0.40
codegen_flags: <defaults>
</compile_context>

<pallas_src>
import functools

import jax
import jax.numpy as jnp
from jax.experimental import pallas as pl
from jax.experimental.pallas import tpu as pltpu


# ----------------------------- Config ---------------------------------------
class Config:
    NUM_PRODUCTS = 20
    PROD_EMB_DIM = 32
    NUM_TYPES = 12
    TYPE_EMB_DIM = 16
    TYPE_HIDDEN = 32        # hidden size of the type-transition MLP
    ITEM_HIDDEN = 64        # hidden size of the item-prediction MLP
    NUM_COMP_TYPES = 3      # K (top-k complementary types)


_LANES = 128
_ROWQ = 16                  # bf16 sublane-packing quantum for wpack blocks


def _round_up(x, m):
    return ((x + m - 1) // m) * m


def _pad_to(x, rows, cols):
    r, c = x.shape
    return jnp.pad(x, ((0, rows - r), (0, cols - c)))


def _layout(cfg):
    """Row layout of the packed bf16 weight buffer (all blocks 128 lanes wide)."""
    P, T = cfg.PROD_EMB_DIM, cfg.TYPE_EMB_DIM
    Ht, Hi = cfg.TYPE_HIDDEN, cfg.ITEM_HIDDEN
    NP, NT = cfg.NUM_PRODUCTS, cfg.NUM_TYPES
    order = ("tt_w1", "tt_w2", "ip_w1q", "ip_w2", "ctbl_t", "g", "prod", "qtype")
    rows = {
        "tt_w1": _round_up(T, _ROWQ),
        "tt_w2": _round_up(Ht, _ROWQ),
        "ip_w1q": _round_up(P, _ROWQ),
        "ip_w2": _round_up(Hi, _ROWQ),
        "ctbl_t": _round_up(T, _ROWQ),
        "g": _round_up(NT, _ROWQ),
        "prod": _round_up(NP, _ROWQ),
        "qtype": _round_up(NT, _ROWQ),
    }
    offs, o = {}, 0
    for name in order:
        offs[name] = o
        o += rows[name]
    return order, rows, offs, o


# ----------------------------- Fused kernel ----------------------------------
def _fused_kernel(qi_ref, qti_ref, wpack_ref, bias_ref,
                  sims_ref, idx_ref, proj_ref,
                  *, B, P, T, Ht, Hi, NT, K, NPp, NTp, offs):
    """Whole P-Companion forward: gathers -> type MLP -> sims -> top-K ->
    batched item-prediction MLP.  Everything VMEM-resident, one launch."""
    f32, bf16 = jnp.float32, jnp.bfloat16
    LANES = sims_ref.shape[-1]

    # ---- static slices of the packed operands (tiny, start-aligned loads) --
    tt_w1 = wpack_ref[offs["tt_w1"]:offs["tt_w1"] + T, :Ht]       # [T, Ht]  bf16
    tt_w2 = wpack_ref[offs["tt_w2"]:offs["tt_w2"] + Ht, :T]       # [Ht, T]  bf16
    ip_w1q = wpack_ref[offs["ip_w1q"]:offs["ip_w1q"] + P, :Hi]    # [P, Hi]  bf16
    ip_w2 = wpack_ref[offs["ip_w2"]:offs["ip_w2"] + Hi, :]        # [Hi,128] bf16 (cols>=P zero)
    ctbl_t = wpack_ref[offs["ctbl_t"]:offs["ctbl_t"] + T, :]      # [T, 128] bf16 (cols>=NT zero)
    g = wpack_ref[offs["g"]:offs["g"] + NTp, :Hi]                 # [NTp,Hi] bf16 (rows>=NT zero)
    prod_tb = wpack_ref[offs["prod"]:offs["prod"] + NPp, :P]      # [NPp,P]  bf16 (pad rows zero)
    qtype_tb = wpack_ref[offs["qtype"]:offs["qtype"] + NTp, :T]   # [NTp,T]  bf16 (pad rows zero)

    tt_b1 = bias_ref[0:1, :Ht]
    tt_b2 = bias_ref[1:2, :T]
    ip_b1 = bias_ref[2:3, :Hi]
    ip_b2 = bias_ref[3:4, :]                                      # [1, 128] (cols>=P zero)

    # ---- fused embedding gathers: exact one-hot bf16 MXU matmuls -----------
    qi = qi_ref[...]                                              # [B, 1] int32
    qti = qti_ref[...]                                            # [B, 1] int32
    oh_prod = (jax.lax.broadcasted_iota(jnp.int32, (B, NPp), 1) == qi).astype(bf16)
    oh_qtype = (jax.lax.broadcasted_iota(jnp.int32, (B, NTp), 1) == qti).astype(bf16)
    qe = jnp.dot(oh_prod, prod_tb, preferred_element_type=f32)    # [B, P]
    qt = jnp.dot(oh_qtype, qtype_tb, preferred_element_type=f32)  # [B, T]

    # ---- ComplementaryTypeTransition MLP (bf16 MXU, f32 accumulate) --------
    h = jnp.maximum(
        jnp.dot(qt.astype(bf16), tt_w1, preferred_element_type=f32) + tt_b1, 0.0)
    comp_base = (jnp.dot(h.astype(bf16), tt_w2, preferred_element_type=f32)
                 + tt_b2)                                         # [B, T]

    # ---- similarities: ctbl_t is pre-transposed & lane-padded -> full-width
    sims = jnp.dot(comp_base.astype(bf16), ctbl_t,
                   preferred_element_type=f32)                    # [B, 128]
    sims_ref[...] = sims

    # ---- item-prediction layer-1, query side: computed ONCE ----------------
    hq = jnp.dot(qe.astype(bf16), ip_w1q, preferred_element_type=f32)  # [B, Hi]

    # ---- iterative top-K: only masks / indices in the loop -----------------
    col128 = jax.lax.broadcasted_iota(jnp.int32, (B, LANES), 1)
    col128_f = col128.astype(f32)
    colNT = jax.lax.broadcasted_iota(jnp.int32, (B, NTp), 1)
    work = jnp.where(col128 < NT, sims, -jnp.inf)                 # mask padded lanes
    idx_tile = jnp.zeros((B, LANES), jnp.int32)
    sel_list = []
    for k in range(K):
        m = jnp.max(work, axis=-1, keepdims=True)                 # [B, 1]
        # argmax with smallest-index tie-break (matches jax.lax.top_k ordering)
        idx_k = jnp.min(jnp.where(work == m, col128_f, jnp.float32(LANES)),
                        axis=-1, keepdims=True).astype(jnp.int32) # [B, 1]
        idx_tile = jnp.where(col128 == k, idx_k, idx_tile)
        work = jnp.where(col128 == idx_k, -jnp.inf, work)
        sel_list.append((colNT == idx_k).astype(bf16))            # [B, NTp]
    idx_ref[...] = idx_tile

    # ---- ONE batched selection matmul + ONE batched projection matmul ------
    sel_all = jnp.concatenate(sel_list, axis=0)                   # [K*B, NTp] (k-major)
    ht_all = jnp.dot(sel_all, g, preferred_element_type=f32)      # [K*B, Hi]
    hq_all = jnp.concatenate([hq] * K, axis=0)                    # [K*B, Hi]
    h1 = jnp.maximum(hq_all + ht_all + ip_b1, 0.0)
    out = (jnp.dot(h1.astype(bf16), ip_w2, preferred_element_type=f32)
           + ip_b2)                                               # [K*B, 128]
    proj_ref[...] = out


# ----------------------------- Params ----------------------------------------
def init_params(cfg, key):
    ks = jax.random.split(key, 8)
    scale = 0.1
    f32, bf16 = jnp.float32, jnp.bfloat16
    P, T, Ht, Hi = cfg.PROD_EMB_DIM, cfg.TYPE_EMB_DIM, cfg.TYPE_HIDDEN, cfg.ITEM_HIDDEN
    NP, NT = cfg.NUM_PRODUCTS, cfg.NUM_TYPES

    prod = scale * jax.random.normal(ks[0], (NP, P), f32)
    qtype = scale * jax.random.normal(ks[1], (NT, T), f32)
    ctbl = scale * jax.random.normal(ks[2], (NT, T), f32)
    tt_w1 = (scale * jax.random.normal(ks[3], (T, Ht), f32)).astype(bf16)
    tt_b1 = jnp.zeros((1, Ht), f32)
    tt_w2 = (scale * jax.random.normal(ks[4], (Ht, T), f32)).astype(bf16)
    tt_b2 = jnp.zeros((1, T), f32)
    ip_w1q = (scale * jax.random.normal(ks[5], (P, Hi), f32)).astype(bf16)
    ip_w1t = (scale * jax.random.normal(ks[6], (T, Hi), f32)).astype(bf16)
    ip_b1 = jnp.zeros((1, Hi), f32)
    ip_w2 = (scale * jax.random.normal(ks[7], (Hi, P), f32)).astype(bf16)
    ip_b2 = jnp.zeros((1, P), f32)

    # Per-call precomputation moved to init: folded gather weight (f32 accum).
    g = jnp.dot(ctbl.astype(bf16), ip_w1t, preferred_element_type=f32)   # [NT, Hi]

    order, rows, offs, total = _layout(cfg)
    blocks = {
        "tt_w1": tt_w1, "tt_w2": tt_w2, "ip_w1q": ip_w1q, "ip_w2": ip_w2,
        "ctbl_t": ctbl.T.astype(bf16), "g": g.astype(bf16),
        "prod": prod.astype(bf16), "qtype": qtype.astype(bf16),
    }
    wpack = jnp.concatenate(
        [_pad_to(blocks[name].astype(bf16), rows[name], _LANES) for name in order],
        axis=0)                                                          # [total, 128] bf16
    bias_pack = jnp.concatenate(
        [_pad_to(tt_b1, 1, _LANES), _pad_to(tt_b2, 1, _LANES),
         _pad_to(ip_b1, 1, _LANES), _pad_to(ip_b2, 1, _LANES)], axis=0)  # [4, 128] f32

    return {
        # packed kernel operands
        "wpack": wpack, "bias_pack": bias_pack,
        # raw parameters (kept for the pure-JAX reference / training code)
        "product_embeddings": prod, "query_type_embeddings": qtype,
        "comp_type_embeddings": ctbl,
        "tt_w1": tt_w1, "tt_b1": tt_b1, "tt_w2": tt_w2, "tt_b2": tt_b2,
        "ip_w1q": ip_w1q, "ip_w1t": ip_w1t, "ip_b1": ip_b1,
        "ip_w2": ip_w2, "ip_b2": ip_b2,
    }


# ----------------------------- Forward wrapper --------------------------------
def make_forward(cfg):
    K, NT, P, T = cfg.NUM_COMP_TYPES, cfg.NUM_TYPES, cfg.PROD_EMB_DIM, cfg.TYPE_EMB_DIM
    Ht, Hi, NP = cfg.TYPE_HIDDEN, cfg.ITEM_HIDDEN, cfg.NUM_PRODUCTS
    _, rows, offs, total_rows = _layout(cfg)
    NPp, NTp = rows["prod"], rows["g"]

    vmem = pl.BlockSpec(memory_space=pltpu.MemorySpace.VMEM)

    @jax.jit
    def forward(params, query_indices, query_types):
        B = query_indices.shape[0]
        kernel = functools.partial(
            _fused_kernel, B=B, P=P, T=T, Ht=Ht, Hi=Hi, NT=NT, K=K,
            NPp=NPp, NTp=NTp, offs=offs)

        qi2d = query_indices.astype(jnp.int32).reshape(B, 1)
        qt2d = query_types.astype(jnp.int32).reshape(B, 1)

        sims_p, idx_p, proj_p = pl.pallas_call(
            kernel,
            out_shape=(
                jax.ShapeDtypeStruct((B, _LANES), jnp.float32),
                jax.ShapeDtypeStruct((B, _LANES), jnp.int32),
                jax.ShapeDtypeStruct((K * B, _LANES), jnp.float32),
            ),
            in_specs=[vmem, vmem, vmem, vmem],
            out_specs=(vmem, vmem, vmem),
            # Grid-less and fully VMEM-resident on purpose: total data is
            # tens of KB; a grid would only add per-step pipeline overhead.
            # TODO(synk): for large B on v7x, add a batch grid (TILE_B multiple
            # of 16) with dimension_semantics=("parallel",) to engage the
            # second TensorCore and bound VMEM (64 MiB on v7x).
        )(qi2d, qt2d, params["wpack"], params["bias_pack"])

        sims = sims_p[:, :NT]
        topk = idx_p[:, :K]
        proj = jnp.transpose(proj_p.reshape(K, B, _LANES)[:, :, :P], (1, 0, 2))
        return {
            "projected_embeddings": proj,
            "complementary_types": topk,
            "type_similarities": sims,
        }

    return forward


# ----------------------------- Pure-JAX reference -----------------------------
def reference_forward(params, cfg, query_indices, query_types):
    f32, bf16 = jnp.float32, jnp.bfloat16
    B = query_indices.shape[0]
    K, P, T = cfg.NUM_COMP_TYPES, cfg.PROD_EMB_DIM, cfg.TYPE_EMB_DIM
    qe = jnp.take(params["product_embeddings"], query_indices, axis=0)
    qt = jnp.take(params["query_type_embeddings"], query_types, axis=0)
    h = jnp.maximum(jnp.dot(qt.astype(bf16), params["tt_w1"],
                            preferred_element_type=f32) + params["tt_b1"], 0.0)
    comp_base = (jnp.dot(h.astype(bf16), params["tt_w2"],
                         preferred_element_type=f32) + params["tt_b2"])
    sims = jnp.dot(comp_base.astype(bf16),
                   params["comp_type_embeddings"].T.astype(bf16),
                   preferred_element_type=f32)
    _, topk = jax.lax.top_k(sims, K)
    ct = jnp.take(params["comp_type_embeddings"], topk, axis=0)          # [B, K, T]
    hq = jnp.dot(qe.astype(bf16), params["ip_w1q"], preferred_element_type=f32)
    ht = jnp.dot(ct.astype(bf16).reshape(B * K, T), params["ip_w1t"],
                 preferred_element_type=f32).reshape(B, K, -1)
    h1 = jnp.maximum(hq[:, None, :] + ht + params["ip_b1"], 0.0)
    Hi = h1.shape[-1]
    proj = (jnp.dot(h1.astype(bf16).reshape(B * K, Hi), params["ip_w2"],
                    preferred_element_type=f32).reshape(B, K, P)
            + params["ip_b2"])
    return {"projected_embeddings": proj, "complementary_types": topk,
            "type_similarities": sims}


# ----------------------------- Main -------------------------------------------
if __name__ == "__main__":
    cfg = Config()
    key = jax.random.PRNGKey(0)
    pkey, ikey, tkey = jax.random.split(key, 3)

    params = init_params(cfg, pkey)

    B = 8
    query_indices = jax.random.randint(ikey, (B,), 0, cfg.NUM_PRODUCTS, dtype=jnp.int32)
    query_types = jax.random.randint(tkey, (B,), 0, cfg.NUM_TYPES, dtype=jnp.int32)

    forward = make_forward(cfg)
    out = forward(params, query_indices, query_types)
    jax.block_until_ready(out)

    assert out["projected_embeddings"].shape == (B, cfg.NUM_COMP_TYPES, cfg.PROD_EMB_DIM)
    assert out["complementary_types"].shape == (B, cfg.NUM_COMP_TYPES)
    assert out["type_similarities"].shape == (B, cfg.NUM_TYPES)

    ref = reference_forward(params, cfg, query_indices, query_types)
    assert jnp.array_equal(out["complementary_types"], ref["complementary_types"])
    assert jnp.allclose(out["type_similarities"], ref["type_similarities"],
                        atol=1e-3, rtol=1e-2)
    assert jnp.allclose(out["projected_embeddings"], ref["projected_embeddings"],
                        atol=2e-3, rtol=2e-2)

    print("KERNEL_OK")
</pallas_src>

<mosaic_0001>
module attributes {stable_mosaic.version = 11 : i64} {
  func.func @_fused_kernel(%arg0: memref<8x1xi32, #tpu.memory_space<vmem>>, %arg1: memref<8x1xi32, #tpu.memory_space<vmem>>, %arg2: memref<224x128xbf16, #tpu.memory_space<vmem>>, %arg3: memref<4x128xf32, #tpu.memory_space<vmem>>, %arg4: memref<8x128xf32, #tpu.memory_space<vmem>>, %arg5: memref<8x128xi32, #tpu.memory_space<vmem>>, %arg6: memref<24x128xf32, #tpu.memory_space<vmem>>) attributes {dimension_semantics = [], scalar_prefetch = 0 : i64, scratch_operands = 0 : i64, tpu.core_type = #tpu.core_type<tc>} {
    %c0 = arith.constant 0 : index
    %c0_0 = arith.constant 0 : index
    %0 = vector.load %arg2[%c0, %c0_0] : memref<224x128xbf16, #tpu.memory_space<vmem>>, vector<16x32xbf16>
    %c16 = arith.constant 16 : index
    %c0_1 = arith.constant 0 : index
    %1 = vector.load %arg2[%c16, %c0_1] : memref<224x128xbf16, #tpu.memory_space<vmem>>, vector<32x16xbf16>
    %c48 = arith.constant 48 : index
    %c0_2 = arith.constant 0 : index
    %2 = vector.load %arg2[%c48, %c0_2] : memref<224x128xbf16, #tpu.memory_space<vmem>>, vector<32x64xbf16>
    %c80 = arith.constant 80 : index
    %c0_3 = arith.constant 0 : index
    %3 = vector.load %arg2[%c80, %c0_3] : memref<224x128xbf16, #tpu.memory_space<vmem>>, vector<64x128xbf16>
    %c144 = arith.constant 144 : index
    %c0_4 = arith.constant 0 : index
    %4 = vector.load %arg2[%c144, %c0_4] : memref<224x128xbf16, #tpu.memory_space<vmem>>, vector<16x128xbf16>
    %c160 = arith.constant 160 : index
    %c0_5 = arith.constant 0 : index
    %5 = vector.load %arg2[%c160, %c0_5] : memref<224x128xbf16, #tpu.memory_space<vmem>>, vector<16x64xbf16>
    %c176 = arith.constant 176 : index
    %c0_6 = arith.constant 0 : index
    %6 = vector.load %arg2[%c176, %c0_6] : memref<224x128xbf16, #tpu.memory_space<vmem>>, vector<32x32xbf16>
    %c208 = arith.constant 208 : index
    %c0_7 = arith.constant 0 : index
    %7 = vector.load %arg2[%c208, %c0_7] : memref<224x128xbf16, #tpu.memory_space<vmem>>, vector<16x16xbf16>
    %c0_8 = arith.constant 0 : index
    %c0_9 = arith.constant 0 : index
    %8 = vector.load %arg3[%c0_8, %c0_9] : memref<4x128xf32, #tpu.memory_space<vmem>>, vector<1x32xf32>
    %c1 = arith.constant 1 : index
    %c0_10 = arith.constant 0 : index
    %9 = vector.load %arg3[%c1, %c0_10] : memref<4x128xf32, #tpu.memory_space<vmem>>, vector<1x16xf32>
    %c2 = arith.constant 2 : index
    %c0_11 = arith.constant 0 : index
    %10 = vector.load %arg3[%c2, %c0_11] : memref<4x128xf32, #tpu.memory_space<vmem>>, vector<1x64xf32>
    %c3 = arith.constant 3 : index
    %c0_12 = arith.constant 0 : index
    %11 = vector.load %arg3[%c3, %c0_12] : memref<4x128xf32, #tpu.memory_space<vmem>>, vector<1x128xf32>
    %c0_13 = arith.constant 0 : index
    %c0_14 = arith.constant 0 : index
    %12 = vector.load %arg0[%c0_13, %c0_14] : memref<8x1xi32, #tpu.memory_space<vmem>>, vector<8x1xi32>
    %c0_15 = arith.constant 0 : index
    %c0_16 = arith.constant 0 : index
    %13 = vector.load %arg1[%c0_15, %c0_16] : memref<8x1xi32, #tpu.memory_space<vmem>>, vector<8x1xi32>
    %14 = tpu.iota {dimensions = array<i32: 1>} : vector<8x32xi32>
    %15 = vector.broadcast %12 : vector<8x1xi32> to vector<8x32xi32>
    %16 = arith.cmpi eq, %14, %15 : vector<8x32xi32>
    %17 = arith.extui %16 : vector<8x32xi1> to vector<8x32xi32>
    %18 = arith.sitofp %17 : vector<8x32xi32> to vector<8x32xf32>
    %19 = arith.truncf %18 : vector<8x32xf32> to vector<8x32xbf16>
    %20 = tpu.iota {dimensions = array<i32: 1>} : vector<8x16xi32>
    %21 = vector.broadcast %13 : vector<8x1xi32> to vector<8x16xi32>
    %22 = arith.cmpi eq, %20, %21 : vector<8x16xi32>
    %23 = arith.extui %22 : vector<8x16xi1> to vector<8x16xi32>
    %24 = arith.sitofp %23 : vector<8x16xi32> to vector<8x16xf32>
    %25 = arith.truncf %24 : vector<8x16xf32> to vector<8x16xbf16>
    %cst = arith.constant dense<0.000000e+00> : vector<8x32xf32>
    %26 = tpu.matmul %19, %6, %cst {dimension_numbers = #tpu.dot_dimension_numbers<[1], [0], [0], [1], [0, 0, 1, 1], [], []>} : vector<8x32xbf16>, vector<32x32xbf16>, vector<8x32xf32> -> vector<8x32xf32>
    %cst_17 = arith.constant dense<0.000000e+00> : vector<8x16xf32>
    %27 = tpu.matmul %25, %7, %cst_17 {dimension_numbers = #tpu.dot_dimension_numbers<[1], [0], [0], [1], [0, 0, 1, 1], [], []>} : vector<8x16xbf16>, vector<16x16xbf16>, vector<8x16xf32> -> vector<8x16xf32>
    %28 = arith.truncf %27 : vector<8x16xf32> to vector<8x16xbf16>
    %cst_18 = arith.constant dense<0.000000e+00> : vector<8x32xf32>
    %29 = tpu.matmul %28, %0, %cst_18 {dimension_numbers = #tpu.dot_dimension_numbers<[1], [0], [0], [1], [0, 0, 1, 1], [], []>} : vector<8x16xbf16>, vector<16x32xbf16>, vector<8x32xf32> -> vector<8x32xf32>
    %30 = vector.broadcast %8 : vector<1x32xf32> to vector<8x32xf32>
    %31 = arith.addf %29, %30 : vector<8x32xf32>
    %cst_19 = arith.constant 0.000000e+00 : f32
    %32 = vector.broadcast %cst_19 : f32 to vector<8x32xf32>
    %33 = arith.maximumf %31, %32 : vector<8x32xf32>
    %34 = arith.truncf %33 : vector<8x32xf32> to vector<8x32xbf16>
    %cst_20 = arith.constant dense<0.000000e+00> : vector<8x16xf32>
    %35 = tpu.matmul %34, %1, %cst_20 {dimension_numbers = #tpu.dot_dimension_numbers<[1], [0], [0], [1], [0, 0, 1, 1], [], []>} : vector<8x32xbf16>, vector<32x16xbf16>, vector<8x16xf32> -> vector<8x16xf32>
    %36 = vector.broadcast %9 : vector<1x16xf32> to vector<8x16xf32>
    %37 = arith.addf %35, %36 : vector<8x16xf32>
    %38 = arith.truncf %37 : vector<8x16xf32> to vector<8x16xbf16>
    %cst_21 = arith.constant dense<0.000000e+00> : vector<8x128xf32>
    %39 = tpu.matmul %38, %4, %cst_21 {dimension_numbers = #tpu.dot_dimension_numbers<[1], [0], [0], [1], [0, 0, 1, 1], [], []>} : vector<8x16xbf16>, vector<16x128xbf16>, vector<8x128xf32> -> vector<8x128xf32>
    %c0_22 = arith.constant 0 : index
    %c0_23 = arith.constant 0 : index
    %40 = vector.load %arg4[%c0_22, %c0_23] : memref<8x128xf32, #tpu.memory_space<vmem>>, vector<8x128xf32>
    tpu.vector_store %arg4[%c0_22, %c0_23], %39 {strides = array<i32>} : memref<8x128xf32, #tpu.memory_space<vmem>>, vector<8x128xf32>,
    %41 = arith.truncf %26 : vector<8x32xf32> to vector<8x32xbf16>
    %cst_24 = arith.constant dense<0.000000e+00> : vector<8x64xf32>
    %42 = tpu.matmul %41, %2, %cst_24 {dimension_numbers = #tpu.dot_dimension_numbers<[1], [0], [0], [1], [0, 0, 1, 1], [], []>} : vector<8x32xbf16>, vector<32x64xbf16>, vector<8x64xf32> -> vector<8x64xf32>
    %43 = tpu.iota {dimensions = array<i32: 1>} : vector<8x128xi32>
    %44 = arith.sitofp %43 : vector<8x128xi32> to vector<8x128xf32>
    %45 = tpu.iota {dimensions = array<i32: 1>} : vector<8x16xi32>
    %c12_i32 = arith.constant 12 : i32
    %46 = vector.broadcast %c12_i32 : i32 to vector<8x128xi32>
    %47 = arith.cmpi slt, %43, %46 : vector<8x128xi32>
    %cst_25 = arith.constant 0xFF800000 : f32
    %48 = vector.broadcast %cst_25 : f32 to vector<8x128xf32>
    %49 = arith.select %47, %39, %48 : vector<8x128xi1>, vector<8x128xf32>
    %c0_i32 = arith.constant 0 : i32
    %50 = vector.broadcast %c0_i32 : i32 to vector<8x128xi32>
    %cst_26 = arith.constant dense<0xFF800000> : vector<8xf32>
    %51 = vector.multi_reduction <maximumf>, %49, %cst_26 [1] : vector<8x128xf32> to vector<8xf32>
    %52 = vector.shape_cast %51 : vector<8xf32> to vector<8x1xf32>
    %53 = vector.broadcast %52 : vector<8x1xf32> to vector<8x128xf32>
    %54 = arith.cmpf oeq, %49, %53 : vector<8x128xf32>
    %cst_27 = arith.constant 1.280000e+02 : f32
    %55 = vector.broadcast %cst_27 : f32 to vector<8x128xf32>
    %56 = arith.select %54, %44, %55 : vector<8x128xi1>, vector<8x128xf32>
    %cst_28 = arith.constant dense<0x7F800000> : vector<8xf32>
    %57 = vector.multi_reduction <minimumf>, %56, %cst_28 [1] : vector<8x128xf32> to vector<8xf32>
    %58 = vector.shape_cast %57 : vector<8xf32> to vector<8x1xf32>
    %59 = arith.fptosi %58 : vector<8x1xf32> to vector<8x1xi32>
    %c0_i32_29 = arith.constant 0 : i32
    %60 = vector.broadcast %c0_i32_29 : i32 to vector<8x128xi32>
    %61 = arith.cmpi eq, %43, %60 : vector<8x128xi32>
    %62 = vector.shape_cast %59 : vector<8x1xi32> to vector<8x1xi32>
    %63 = vector.broadcast %62 : vector<8x1xi32> to vector<8x128xi32>
    %64 = arith.select %61, %63, %50 : vector<8x128xi1>, vector<8x128xi32>
    %65 = vector.broadcast %59 : vector<8x1xi32> to vector<8x128xi32>
    %66 = arith.cmpi eq, %43, %65 : vector<8x128xi32>
    %cst_30 = arith.constant 0xFF800000 : f32
    %67 = vector.broadcast %cst_30 : f32 to vector<8x128xf32>
    %68 = arith.select %66, %67, %49 : vector<8x128xi1>, vector<8x128xf32>
    %69 = vector.broadcast %59 : vector<8x1xi32> to vector<8x16xi32>
    %70 = arith.cmpi eq, %45, %69 : vector<8x16xi32>
    %71 = arith.extui %70 : vector<8x16xi1> to vector<8x16xi32>
    %72 = arith.sitofp %71 : vector<8x16xi32> to vector<8x16xf32>
    %73 = arith.truncf %72 : vector<8x16xf32> to vector<8x16xbf16>
    %cst_31 = arith.constant dense<0xFF800000> : vector<8xf32>
    %74 = vector.multi_reduction <maximumf>, %68, %cst_31 [1] : vector<8x128xf32> to vector<8xf32>
    %75 = vector.shape_cast %74 : vector<8xf32> to vector<8x1xf32>
    %76 = vector.broadcast %75 : vector<8x1xf32> to vector<8x128xf32>
    %77 = arith.cmpf oeq, %68, %76 : vector<8x128xf32>
    %cst_32 = arith.constant 1.280000e+02 : f32
    %78 = vector.broadcast %cst_32 : f32 to vector<8x128xf32>
    %79 = arith.select %77, %44, %78 : vector<8x128xi1>, vector<8x128xf32>
    %cst_33 = arith.constant dense<0x7F800000> : vector<8xf32>
    %80 = vector.multi_reduction <minimumf>, %79, %cst_33 [1] : vector<8x128xf32> to vector<8xf32>
    %81 = vector.shape_cast %80 : vector<8xf32> to vector<8x1xf32>
    %82 = arith.fptosi %81 : vector<8x1xf32> to vector<8x1xi32>
    %c1_i32 = arith.constant 1 : i32
    %83 = vector.broadcast %c1_i32 : i32 to vector<8x128xi32>
    %84 = arith.cmpi eq, %43, %83 : vector<8x128xi32>
    %85 = vector.shape_cast %82 : vector<8x1xi32> to vector<8x1xi32>
    %86 = vector.broadcast %85 : vector<8x1xi32> to vector<8x128xi32>
    %87 = arith.select %84, %86, %64 : vector<8x128xi1>, vector<8x128xi32>
    %88 = vector.broadcast %82 : vector<8x1xi32> to vector<8x128xi32>
    %89 = arith.cmpi eq, %43, %88 : vector<8x128xi32>
    %cst_34 = arith.constant 0xFF800000 : f32
    %90 = vector.broadcast %cst_34 : f32 to vector<8x128xf32>
    %91 = arith.select %89, %90, %68 : vector<8x128xi1>, vector<8x128xf32>
    %92 = vector.broadcast %82 : vector<8x1xi32> to vector<8x16xi32>
    %93 = arith.cmpi eq, %45, %92 : vector<8x16xi32>
    %94 = arith.extui %93 : vector<8x16xi1> to vector<8x16xi32>
    %95 = arith.sitofp %94 : vector<8x16xi32> to vector<8x16xf32>
    %96 = arith.truncf %95 : vector<8x16xf32> to vector<8x16xbf16>
    %cst_35 = arith.constant dense<0xFF800000> : vector<8xf32>
    %97 = vector.multi_reduction <maximumf>, %91, %cst_35 [1] : vector<8x128xf32> to vector<8xf32>
    %98 = vector.shape_cast %97 : vector<8xf32> to vector<8x1xf32>
    %99 = vector.broadcast %98 : vector<8x1xf32> to vector<8x128xf32>
    %100 = arith.cmpf oeq, %91, %99 : vector<8x128xf32>
    %cst_36 = arith.constant 1.280000e+02 : f32
    %101 = vector.broadcast %cst_36 : f32 to vector<8x128xf32>
    %102 = arith.select %100, %44, %101 : vector<8x128xi1>, vector<8x128xf32>
    %cst_37 = arith.constant dense<0x7F800000> : vector<8xf32>
    %103 = vector.multi_reduction <minimumf>, %102, %cst_37 [1] : vector<8x128xf32> to vector<8xf32>
    %104 = vector.shape_cast %103 : vector<8xf32> to vector<8x1xf32>
    %105 = arith.fptosi %104 : vector<8x1xf32> to vector<8x1xi32>
    %c2_i32 = arith.constant 2 : i32
    %106 = vector.broadcast %c2_i32 : i32 to vector<8x128xi32>
    %107 = arith.cmpi eq, %43, %106 : vector<8x128xi32>
    %108 = vector.shape_cast %105 : vector<8x1xi32> to vector<8x1xi32>
    %109 = vector.broadcast %108 : vector<8x1xi32> to vector<8x128xi32>
    %110 = arith.select %107, %109, %87 : vector<8x128xi1>, vector<8x128xi32>
    %111 = vector.broadcast %105 : vector<8x1xi32> to vector<8x16xi32>
    %112 = arith.cmpi eq, %45, %111 : vector<8x16xi32>
    %113 = arith.extui %112 : vector<8x16xi1> to vector<8x16xi32>
    %114 = arith.sitofp %113 : vector<8x16xi32> to vector<8x16xf32>
    %115 = arith.truncf %114 : vector<8x16xf32> to vector<8x16xbf16>
    %c0_38 = arith.constant 0 : index
    %c0_39 = arith.constant 0 : index
    %116 = vector.load %arg5[%c0_38, %c0_39] : memref<8x128xi32, #tpu.memory_space<vmem>>, vector<8x128xi32>
    tpu.vector_store %arg5[%c0_38, %c0_39], %110 {strides = array<i32>} : memref<8x128xi32, #tpu.memory_space<vmem>>, vector<8x128xi32>,
    %117 = tpu.concatenate %73, %96, %115 in 0 : vector<8x16xbf16>, vector<8x16xbf16>, vector<8x16xbf16> -> vector<24x16xbf16>
    %cst_40 = arith.constant dense<0.000000e+00> : vector<24x64xf32>
    %118 = tpu.matmul %117, %5, %cst_40 {dimension_numbers = #tpu.dot_dimension_numbers<[1], [0], [0], [1], [0, 0, 1, 1], [], []>} : vector<24x16xbf16>, vector<16x64xbf16>, vector<24x64xf32> -> vector<24x64xf32>
    %119 = tpu.concatenate %42, %42, %42 in 0 : vector<8x64xf32>, vector<8x64xf32>, vector<8x64xf32> -> vector<24x64xf32>
    %120 = arith.addf %119, %118 : vector<24x64xf32>
    %121 = vector.broadcast %10 : vector<1x64xf32> to vector<24x64xf32>
    %122 = arith.addf %120, %121 : vector<24x64xf32>
    %cst_41 = arith.constant 0.000000e+00 : f32
    %123 = vector.broadcast %cst_41 : f32 to vector<24x64xf32>
    %124 = arith.maximumf %122, %123 : vector<24x64xf32>
    %125 = arith.truncf %124 : vector<24x64xf32> to vector<24x64xbf16>
    %cst_42 = arith.constant dense<0.000000e+00> : vector<24x128xf32>
    %126 = tpu.matmul %125, %3, %cst_42 {dimension_numbers = #tpu.dot_dimension_numbers<[1], [0], [0], [1], [0, 0, 1, 1], [], []>} : vector<24x64xbf16>, vector<64x128xbf16>, vector<24x128xf32> -> vector<24x128xf32>
    %127 = vector.broadcast %11 : vector<1x128xf32> to vector<24x128xf32>
    %128 = arith.addf %126, %127 : vector<24x128xf32>
    %c0_43 = arith.constant 0 : index
    %c0_44 = arith.constant 0 : index
    %129 = vector.load %arg6[%c0_43, %c0_44] : memref<24x128xf32, #tpu.memory_space<vmem>>, vector<24x128xf32>
    tpu.vector_store %arg6[%c0_43, %c0_44], %128 {strides = array<i32>} : memref<24x128xf32, #tpu.memory_space<vmem>>, vector<24x128xf32>,
    return
  }
}

</mosaic_0001>

<bundles_post_ra>
// kernel: forward.1
= control target key start
LH: loop header
LB: loop body
LE: loop exit
PB: predicated region body
PF: predicated region fallthrough
CT: control target
= control target key end

     0   :  { %12 = vsyncpa [#allocation3], 0  ;;  %s993_s0 = inlined_call_operand.vmem [shape: s32[8,1], index: 0, kind: input, shape index: {}]   ;;  %s994_s1 = inlined_call_operand.vmem [shape: s32[8,1], index: 1, kind: input, shape index: {}]   ;;  %s995_s2 = inlined_call_operand.hbm [shape: bf16[224,128], index: 2, kind: input, shape index: {}]   ;;  %s996_s3 = inlined_call_operand.vmem [shape: f32[4,128], index: 3, kind: input, shape index: {}]   ;;  %s997_s4 = inlined_call_operand.hbm [shape: f32[8,128], index: 4, kind: output, shape index: {0}]   ;;  %s998_s5 = inlined_call_operand.vmem [shape: s32[8,128], index: 5, kind: output, shape index: {1}]   ;;  %s999_s6 = inlined_call_operand.vmem [shape: f32[24,128], index: 6, kind: output, shape index: {2}]  }
   0x1   :  { %13 = vsyncpa [#allocation4], 0  ;;  %s842_s21 = smov [#allocation2]   ;;  %s794_s25 = scalar_lea.hbm %s995_s2, 1792 }
   0x2   :  { %s23_s22 = sshll.u32 %s842_s21, 4  ;;  %p795_p0 = scmp.ne.s32.totalorder %s995_s2, %s794_s25  ;;  %s24_s22 = int_to_ptr.vmem [resolvable:$true] %s23_s22 }
   0x3   :  { %p798_p1 = scmp.lt.u32.totalorder %s794_s25, %s995_s2 }
   0x5   :  { %p800_p2 = pnand %p798_p1, %p795_p0 }
   0x7   :  { %803 = shalt.err (!%p800_p2)
}
   0x8   :  { %s804_s30 = scalar_lea.vmem %s24_s22, 1792  ;;  %p809_p4 = scmp.lt.s32.totalorder %s24_s22, %s24_s22 }
   0x9   :  { %p805_p3 = scmp.ne.s32.totalorder %s24_s22, %s804_s30  ;;  %p810_p5 = scmp.lt.s32.totalorder %s804_s30, %s804_s30 }
   0xb   :  { %p811_p6 = por %p810_p5, %p809_p4 }
   0xd   :  { %p812_p7 = pnand %p811_p6, %p805_p3 }
   0xf   :  { %815 = shalt.err (!%p812_p7)
}
  0x10   :  { %s843_s7 = smov 64   ;;  %s844_s8 = smov 4  }
  0x11   :  { %29 = dma.hbm_to_vmem [thread:$0]  %s995_s2, 1792, %s24_s22, [#allocation3], %s843_s7, %s843_s7, %s844_s8  }
  0x12   :  { %838 = dma.done.wait [#allocation3], 1792  }
  0x13   :  { %839 = vsyncadd [#allocation3], 4294965504  ;;  %v845_v0 = vmov 0   ;;  %v846_v1 = vmov 0.0   ;;  %v69_v2 = vld [vmem:[%s994_s1] sm:$0xff]  ;;  %v780_v3 = vld [vmem:[#allocation2 + $0x68] sm:$0xff]   ;;  %v70_v4 = vlaneseq }
  0x14   :  { %778 = vset.pattern.permute.xlu0 %v845_v0  ;;  %713 = vmatprep.subr.bf16.mxu1 %v846_v1  ;;  %vm847_vm0 = vmmov 0   ;;  %vm148_vm2 = vcmask 130048   ;;  %v781_v8 = vld [vmem:[#allocation2] sm:$0xff]   ;;  %v782_v11 = vld [vmem:[#allocation2 + $0x8] sm:$0xff]   ;;  %v783_v16 = vld [vmem:[#allocation2 + $0x10] sm:$0xff]   ;;  %vm98_vm3 = vcmask 261120  }
  0x15   :  { %779 = vset.pattern.permute.xlu1 %v845_v0  ;;  %705 = vmatprep.subr.bf16.mxu0 %v846_v1  ;;  %v906_v5 = vand.u32 127, %v70_v4  ;;  %v655_v17 = vld [vmem:[%s996_s3] ss:$0 sm:$0xff]  ;;  %v784_v24 = vld [vmem:[#allocation2 + $0x48] sm:$0xff]   ;;  %v658_v26 = vld [vmem:[%s996_s3 + $0x1] ss:$0 sm:$0xff] }
  0x16   :  { %80 = vperm.xlu0 %778, %v69_v2   ;;  %714 = vmatpush3.bf16.msra.mxu1 %v780_v3  ;;  %v68_v45 = vld [vmem:[%s993_s0] sm:$0xff]  ;;  %v785_v46 = vld [vmem:[#allocation2 + $0x58] sm:$0xff]   ;;  %vm461_vm12 = vcmask 1043456   ;;  %v789_v3 = vld [vmem:[#allocation2 + $0x50] sm:$0xff]  }
  0x17   :  { %715 = vmatprep.mubr.msk.bf16.mxu1 %vm847_vm0, %v846_v1  ;;  %719 = vmatprep.subr.bf16.mxu1 %v846_v1  ;;  %vm415_vm4 = vcmp.lt.s32.totalorder %v906_v5, 12  ;;  %v931_v38 = vcvt.s32.f32 %v906_v5  ;;  %v786_v47 = vld [vmem:[#allocation2 + $0x60] sm:$0xff]   ;;  %vm424_vm9 = vcmp.eq.s32.totalorder %v906_v5, 0  ;;  %vm438_vm10 = vcmp.eq.s32.totalorder %v906_v5, 1  ;;  %v787_v2 = vld [vmem:[#allocation2 + $0x18] sm:$0xff]  }
  0x18   :  { %709 = vmatprep.mubr.msk.bf16.mxu0 %vm847_vm0, %v846_v1  ;;  %706 = vmatpush3.bf16.msra.mxu0 %v785_v46  ;;  %v788_v4 = vld [vmem:[#allocation2 + $0x20] sm:$0xff]   ;;  %vm452_vm14 = vcmp.eq.s32.totalorder %v906_v5, 2 }
  0x19   :  { %707 = vmatprep.subr.bf16.mxu0 %v846_v1 }
  0x1c   :  { %708 = vmatpush3.bf16.msra.mxu0 %v786_v47 }
  0x1d   :  { %739 = vmatprep.subr.bf16.mxu0 %v846_v1 }
  0x95   :  { %v81_v6 = vpop.permute.xlu0 %80 }
  0x96   :  { %vm82_vm1 = vcmp.eq.s32.totalorder %v906_v5, %v81_v6 }
  0x97   :  { %v649_v7 = vsel %vm82_vm1, 1.0, %v846_v1 }
  0x98   :  { %v85_v9 = vpack.c.bf16 %v649_v7, %v649_v7 }
  0x9a   :  { %716 = vmatmul.mubr.msk.bf16.vlgmr.msra.gmra.mrb[0].mxu1 %vm148_vm2, %v85_v9 }
  0x9b   :  { %720 = vmatpush3.bf16.msra.mxu1 %v781_v8  ;;  %721 = vmatprep.mubr.msk.bf16.mxu1 %vm847_vm0, %v846_v1 }
  0x9c   :  { %725 = vmatprep.subr.bf16.mxu1 %v846_v1 }
 0x16d   :  { %v186_v10 = vpop.f32.mrb[0].mxu1 }
 0x16e   :  { %v192_v12 = vpack.c.bf16 %v186_v10, %v186_v10  ;;  %v717_v13 = vpop.f32.mrb[1].mxu1 }
 0x16f   :  { %v189_v14 = vpop.f32.mrb[2].mxu1  ;;  %v790_v13 = vld [vmem:[#allocation2 + $0x28] sm:$0xff]  }
 0x170   :  { %v718_v15 = vpop.f32.mrb[3].mxu1  ;;  %722 = vmatmul.mubr.msk.bf16.vlgmr.msra.gmra.mrb[4].mxu1 %vm148_vm2, %v192_v12 }
 0x171   :  { %726 = vmatpush3.bf16.msra.mxu1 %v782_v11  ;;  %729 = vmatprep.mubr.msk.bf16.mxu1 %vm847_vm0, %v846_v1 }
 0x172   :  { %727 = vmatprep.subr.bf16.mxu1 %v846_v1 }
 0x175   :  { %728 = vmatpush3.bf16.msra.mxu1 %v783_v16 }
 0x176   :  { %733 = vmatprep.subr.bf16.mxu1 %v846_v1 }
 0x243   :  { %v240_v18 = vpop.f32.mrb[4].mxu1 }
 0x244   :  { %v241_v19 = vadd.f32 %v655_v17, %v240_v18  ;;  %v723_v20 = vpop.f32.mrb[5].mxu1 }
 0x245   :  { %v243_v21 = vpop.f32.mrb[6].mxu1 }
 0x246   :  { %v246_v22 = vmax.f32 %v241_v19, 0.0  ;;  %v724_v23 = vpop.f32.mrb[7].mxu1 }
 0x248   :  { %v247_v25 = vpack.c.bf16 %v246_v22, %v246_v22 }
 0x24a   :  { %730 = vmatmul.mubr.msk.bf16.vlgmr.msra.gmra.mrb[8].mxu1 %vm98_vm3, %v247_v25  ;;  %v792_v25 = vld [vmem:[#allocation2 + $0x38] sm:$0xff]  }
 0x24b   :  { %734 = vmatpush3.bf16.msra.mxu1 %v784_v24  ;;  %735 = vmatprep.mubr.msk.bf16.mxu1 %vm847_vm0, %v846_v1  ;;  %v791_v24 = vld [vmem:[#allocation2 + $0x30] sm:$0xff]  }
 0x24c   :  { %747 = vmatprep.subr.bf16.mxu1 %v789_v3 }
 0x31d   :  { %v301_v27 = vpop.f32.mrb[8].mxu1 }
 0x31e   :  { %v302_v28 = vadd.f32 %v658_v26, %v301_v27  ;;  %v731_v29 = vpop.f32.mrb[9].mxu1  ;;  %v793_v26 = vld [vmem:[#allocation2 + $0x40] sm:$0xff]  }
 0x31f   :  { %v304_v30 = vpop.f32.mrb[10].mxu1 }
 0x320   :  { %v307_v31 = vpack.c.bf16 %v302_v28, %v302_v28  ;;  %v732_v32 = vpop.f32.mrb[11].mxu1 }
 0x322   :  { %736 = vmatmul.mubr.msk.bf16.vlgmr.msra.gmra.mrb[12].mxu1 %vm148_vm2, %v307_v31 }
 0x323   :  { %748 = vmatpush3.bf16.msra.mxu1 %v789_v3 }
 0x3f5   :  { %v351_v33 = vpop.f32.mrb[12].mxu1 }
 0x3f6   :  { %357 = vst [vmem:[#allocation5] sm:$0xff] %v351_v33  ;;  %v737_v34 = vpop.f32.mrb[13].mxu1  ;;  %v416_v35 = vsel %vm415_vm4, %v351_v33, -inf }
 0x3f7   :  { %417 = vmax.xlane.f32.xlu0 %v416_v35  ;;  %v354_v36 = vpop.f32.mrb[14].mxu1 }
 0x3f8   :  { %v738_v37 = vpop.f32.mrb[15].mxu1 }
 0x484   :  { %v418_v39 = vpop.xlane.xlu0 %417 }
 0x485   :  { %vm419_vm5 = vcmp.eq.f32.partialorder %v416_v35, %v418_v39 }
 0x486   :  { %v420_v40 = vsel %vm419_vm5, %v931_v38, 128.0 }
 0x487   :  { %421 = vmin.xlane.f32.xlu1 %v420_v40 }
 0x514   :  { %v422_v41 = vpop.xlane.xlu1 %421 }
 0x515   :  { %v765_v42 = vtrunc.f32 %v422_v41 }
 0x517   :  { %v766_v43 = vcvt.f32.s32 %v765_v42 }
 0x519   :  { %vm426_vm6 = vcmp.eq.s32.totalorder %v906_v5, %v766_v43  ;;  %v425_v56 = vsel %vm424_vm9, %v766_v43, 0 }
 0x51a   :  { %v427_v44 = vsel %vm426_vm6, -inf, %v416_v35  ;;  %v667_v58 = vsel %vm426_vm6, 1.0, %v846_v1 }
 0x51b   :  { %431 = vmax.xlane.f32.xlu1 %v427_v44  ;;  %v430_v62 = vpack.c.bf16 %v667_v58, %v667_v58 }
 0x52c   :  { %73 = vperm.xlu1 %779, %v68_v45  }
 0x5a8   :  { %v432_v48 = vpop.xlane.xlu1 %431 }
 0x5a9   :  { %vm433_vm7 = vcmp.eq.f32.partialorder %v427_v44, %v432_v48 }
 0x5aa   :  { %v434_v49 = vsel %vm433_vm7, %v931_v38, 128.0 }
 0x5ab   :  { %435 = vmin.xlane.f32.xlu1 %v434_v49 }
 0x5ac   :  { %v74_v50 = vpop.permute.xlu1 %73 }
 0x5ad   :  { %vm75_vm8 = vcmp.eq.s32.totalorder %v906_v5, %v74_v50 }
 0x5ae   :  { %v648_v51 = vsel %vm75_vm8, 1.0, %v846_v1 }
 0x5af   :  { %v78_v52 = vpack.c.bf16 %v648_v51, %v648_v51 }
 0x5b1   :  { %710 = vmatmul.mubr.msk.bf16.vlgmr.msra.gmra.mrb[0].mxu0 %vm98_vm3, %v78_v52 }
 0x5b2   :  { %743 = vmatprep.mubr.msk.bf16.mxu0 %vm847_vm0, %v846_v1  ;;  %740 = vmatpush3.bf16.msra.mxu0 %v787_v2  ;;  %vm567_vm0 = vcmask 523264  }
 0x5b3   :  { %741 = vmatprep.subr.bf16.mxu0 %v846_v1 }
 0x5b6   :  { %742 = vmatpush3.bf16.msra.mxu0 %v788_v4 }
 0x5b7   :  { %753 = vmatprep.subr.bf16.mxu0 %v790_v13 }
 0x638   :  { %v436_v53 = vpop.xlane.xlu1 %435 }
 0x639   :  { %v767_v54 = vtrunc.f32 %v436_v53 }
 0x63b   :  { %v768_v55 = vcvt.f32.s32 %v767_v54 }
 0x63d   :  { %v439_v57 = vsel %vm438_vm10, %v768_v55, %v425_v56  ;;  %vm440_vm11 = vcmp.eq.s32.totalorder %v906_v5, %v768_v55 }
 0x63e   :  { %v441_v59 = vsel %vm440_vm11, -inf, %v427_v44  ;;  %v668_v60 = vsel %vm440_vm11, 1.0, %v846_v1 }
 0x63f   :  { %v444_v61 = vpack.c.bf16 %v668_v60, %v668_v60  ;;  %445 = vmax.xlane.f32.xlu0 %v441_v59 }
 0x641   :  { %v460_v63 = vrot.slane %v444_v61, 4 }
 0x643   :  { %v464_v0 = vsel %vm461_vm12, %v430_v62, %v460_v63 }
 0x644   :  { %749 = vmatprep.mubr.msk.bf16.mxu1 %vm148_vm2, %v464_v0 }
 0x684   :  { %v136_v6 = vpop.f32.mrb[0].mxu0 }
 0x685   :  { %v358_v7 = vpack.c.bf16 %v136_v6, %v136_v6  ;;  %v711_v8 = vpop.f32.mrb[1].mxu0 }
 0x686   :  { %v139_v9 = vpop.f32.mrb[2].mxu0 }
 0x687   :  { %v712_v10 = vpop.f32.mrb[3].mxu0  ;;  %744 = vmatmul.mubr.msk.bf16.vlgmr.msra.gmra.mrb[4].mxu0 %vm98_vm3, %v358_v7 }
 0x688   :  { %754 = vmatpush3.bf16.msra.mxu0 %v790_v13 }
 0x689   :  { %755 = vmatprep.subr.bf16.mxu0 %v791_v24 }
 0x68c   :  { %756 = vmatpush3.bf16.msra.mxu0 %v791_v24 }
 0x68d   :  { %757 = vmatprep.subr.bf16.mxu0 %v792_v25 }
 0x690   :  { %758 = vmatpush3.bf16.msra.mxu0 %v792_v25 }
 0x691   :  { %759 = vmatprep.subr.bf16.mxu0 %v793_v26 }
 0x694   :  { %760 = vmatpush3.bf16.msra.mxu0 %v793_v26 }
 0x6cc   :  { %v446_v11 = vpop.xlane.xlu0 %445 }
 0x6cd   :  { %vm447_vm13 = vcmp.eq.f32.partialorder %v441_v59, %v446_v11 }
 0x6ce   :  { %v448_v12 = vsel %vm447_vm13, %v931_v38, 128.0 }
 0x6cf   :  { %449 = vmin.xlane.f32.xlu0 %v448_v12 }
 0x75a   :  { %v408_v14 = vpop.f32.mrb[4].mxu0 }
 0x75b   :  { %v745_v15 = vpop.f32.mrb[5].mxu0 }
 0x75c   :  { %v450_v16 = vpop.xlane.xlu0 %449  ;;  %v411_v17 = vpop.f32.mrb[6].mxu0 }
 0x75d   :  { %v769_v18 = vtrunc.f32 %v450_v16  ;;  %v746_v19 = vpop.f32.mrb[7].mxu0 }
 0x75f   :  { %v770_v20 = vcvt.f32.s32 %v769_v18 }
 0x761   :  { %v453_v21 = vsel %vm452_vm14, %v770_v20, %v439_v57  ;;  %vm454_vm15 = vcmp.eq.s32.totalorder %v906_v5, %v770_v20 }
 0x762   :  { %v669_v22 = vsel %vm454_vm15, 1.0, %v846_v1  ;;  %458 = vst [vmem:[%s998_s5] sm:$0xff] %v453_v21  ;;  %v673_v1 = vld [vmem:[%s996_s3 + $0x2] ss:$0 sm:$0xff]  ;;  %s848_s5 = smov [#allocation5]  }
 0x763   :  { %v457_v23 = vpack.c.bf16 %v669_v22, %v669_v22  ;;  %s631_s20 = sshll.u32 %s848_s5, 4  ;;  %s632_s20 = int_to_ptr.vmem [resolvable:$true] %s631_s20 }
 0x764   :  { %s816_s21 = scalar_lea.vmem %s632_s20, 128  ;;  %p821_p9 = scmp.lt.s32.totalorder %s632_s20, %s632_s20 }
 0x765   :  { %750 = vmatmul.mubr.msk.bf16.vlgmr.msra.gmra.mrb[16].mxu1 %vm148_vm2, %v457_v23  ;;  %p817_p8 = scmp.ne.s32.totalorder %s632_s20, %s816_s21  ;;  %p822_p10 = scmp.lt.s32.totalorder %s816_s21, %s816_s21 }
 0x767   :  { %p823_p11 = por %p822_p10, %p821_p9 }
 0x769   :  { %p824_p12 = pnand %p823_p11, %p817_p8 }
 0x838   :  { %v751_v5 = vpop.f32.mrb[16].mxu1 }
 0x839   :  { %v526_v27 = vadd.f32 %v751_v5, %v408_v14  ;;  %v510_v28 = vpop.f32.mrb[17].mxu1 }
 0x83a   :  { %v524_v29 = vadd.f32 %v510_v28, %v408_v14  ;;  %v752_v30 = vpop.f32.mrb[18].mxu1 }
 0x83b   :  { %v533_v31 = vadd.f32 %v673_v1, %v526_v27  ;;  %v513_v32 = vpop.f32.mrb[19].mxu1 }
 0x83c   :  { %v531_v33 = vadd.f32 %v673_v1, %v524_v29  ;;  %v525_v34 = vadd.f32 %v513_v32, %v408_v14 }
 0x83d   :  { %v536_v36 = vmax.f32 %v533_v31, 0.0 }
 0x83e   :  { %v532_v35 = vadd.f32 %v673_v1, %v525_v34  ;;  %v534_v37 = vmax.f32 %v531_v33, 0.0 }
 0x83f   :  { %v538_v40 = vpack.c.bf16 %v536_v36, %v536_v36 }
 0x840   :  { %v535_v38 = vmax.f32 %v532_v35, 0.0 }
 0x842   :  { %v537_v39 = vpack.c.bf16 %v535_v38, %v534_v37 }
 0x844   :  { %761 = vmatprep.mubr.msk.bf16.mxu0 %vm567_vm0, %v537_v39 }
 0x845   :  { %762 = vmatmul.mubr.msk.bf16.vlgmr.msra.gmra.mrb[8].mxu0 %vm567_vm0, %v538_v40 }
 0x846   :  { %827 = shalt.err (!%p824_p12)
}
 0x847   :  { %s828_s24 = scalar_lea.hbm %s997_s4, 128 }
 0x848   :  { %p829_p13 = scmp.ne.s32.totalorder %s997_s4, %s828_s24  ;;  %p832_p0 = scmp.lt.u32.totalorder %s828_s24, %s997_s4 }
 0x84a   :  { %p834_p1 = pnand %p832_p0, %p829_p13 }
 0x84c   :  { %837 = shalt.err (!%p834_p1)
}
 0x84d   :  { %634 = dma.vmem_to_hbm [thread:$0]  %s632_s20, 128, %s997_s4, [#allocation4]   ;;  %v674_v41 = vld [vmem:[%s996_s3 + $0x3] ss:$0 sm:$0xff] }
 0x918   :  { %v763_v42 = vpop.f32.mrb[8].mxu0 }
 0x919   :  { %v617_v43 = vadd.f32 %v763_v42, %v674_v41  ;;  %v608_v44 = vpop.f32.mrb[9].mxu0 }
 0x91a   :  { %v609_v45 = vadd.f32 %v674_v41, %v608_v44  ;;  %v764_v46 = vpop.f32.mrb[10].mxu0 }
 0x91b   :  { %624 = vst [vmem:[%s999_s6 + $0x10] sm:$0xff] %v617_v43  ;;  %v611_v47 = vpop.f32.mrb[11].mxu0 }
 0x91c   :  { %622 = vst [vmem:[%s999_s6] sm:$0xff] %v609_v45  ;;  %v612_v48 = vadd.f32 %v674_v41, %v611_v47 }
 0x91e   :  { %623 = vst [vmem:[%s999_s6 + $0x8] sm:$0xff] %v612_v48 }
 0x91f   :  { %840 = dma.done.wait [#allocation4], 128  }
 0x920   :  { %841 = vsyncadd [#allocation4], 4294967168 }
 0x921   :  { %646 = vsyncpa [#allocation3], 1 }
 0x922   :  { %647 = vsyncpa [#allocation4], 1 }

</bundles_post_ra>
